<compile_context>
chip_gen: v7x
topology: tpu7x:2x2x1
jax: 0.10.0
libtpu: 0.0.40
codegen_flags: <defaults>
</compile_context>

<pallas_src>
import functools

import jax
import jax.numpy as jnp
from jax.experimental import pallas as pl
from jax.experimental.pallas import tpu as pltpu

C_S = 384        # single-representation channels
N_ATOMS = 37     # atom37 representation


def _round_up(x, m):
    return ((x + m - 1) // m) * m


def _pick_tile_m(n_res, requested, row_mult):
    """Row-tile size: big enough to amortize per-step overhead, small enough that
    grid_m >= ~4 so the pipeline overlaps and v7x megacore can shard."""
    # Quarter the rows -> grid of ~4 ...
    quarter = _round_up(max(pl.cdiv(n_res, 4), 1), row_mult)
    # ... but keep tiles >= ~256 rows (per-grid-step overhead ~0.35 us), and never
    # larger than the (rounded-up) input itself or what the caller requested.
    floor = min(256, _round_up(n_res, row_mult))
    tile = min(requested, max(quarter, floor))
    return max(tile, row_mult)


def _resolved_head_kernel(x_ref, w_ref, b_ref, o_ref):
    # One row-tile of the single representation; full weight + bias resident in VMEM.
    # MXU matmul with f32 accumulation, bias add on the VPU, cast on store.
    acc = jnp.dot(x_ref[...], w_ref[...], preferred_element_type=jnp.float32)
    o_ref[...] = (acc + b_ref[...]).astype(o_ref.dtype)


@functools.partial(jax.jit, static_argnames=("tile_m",))
def experimentally_resolved_head(single, weight_t, bias, *, tile_m=1024):
    """Forward pass: returns dict(logits=[N_res, 37]).

    single   : [N_res, 384]   (f32 or bf16; passed through without casting)
    weight_t : [384, 37]      (transposed PyTorch Linear weight)
    bias     : [37]

    tile_m defaults to 1024 rows (roughly 86% of the HBM roofline at that size, ~3 MiB
    double-buffered f32 input -> fits every generation's scoped-VMEM default), but is
    shrunk automatically so grid_m >= ~4 for typical AlphaFold sequence lengths.
    """
    n_res, c_s = single.shape
    assert c_s == C_S
    assert weight_t.shape == (C_S, N_ATOMS)
    assert bias.shape == (N_ATOMS,)

    # Sublane multiple for the row-tile (bf16 packs 16 rows/vreg, f32 packs 8).
    row_mult = 16 if single.dtype == jnp.bfloat16 else 8
    tile_m = _pick_tile_m(n_res, tile_m, row_mult)
    grid_m = pl.cdiv(n_res, tile_m)           # no jnp.pad of `single`: Pallas masks the
                                              # partial last block's writeback.

    bias2d = bias.reshape(1, N_ATOMS)

    itemsize = jnp.dtype(single.dtype).itemsize
    cost = pl.CostEstimate(
        flops=2 * n_res * C_S * N_ATOMS,
        transcendentals=0,
        bytes_accessed=(n_res * (C_S + N_ATOMS) * itemsize
                        + (C_S * N_ATOMS + N_ATOMS) * jnp.dtype(weight_t.dtype).itemsize),
    )

    logits = pl.pallas_call(
        _resolved_head_kernel,
        out_shape=jax.ShapeDtypeStruct((n_res, N_ATOMS), single.dtype),
        grid_spec=pltpu.PrefetchScalarGridSpec(
            num_scalar_prefetch=0,
            grid=(grid_m,),
            in_specs=[
                # row tile of the single representation (streamed from HBM)
                pl.BlockSpec((tile_m, C_S), lambda i: (i, 0)),
                # full weight matrix, same block every iteration -> VMEM-resident,
                # single-buffered (no need for a second pipeline buffer)
                pl.BlockSpec((C_S, N_ATOMS), lambda i: (0, 0),
                             pipeline_mode=pl.Buffered(1)),
                # bias row, same block every iteration -> VMEM-resident
                pl.BlockSpec((1, N_ATOMS), lambda i: (0, 0),
                             pipeline_mode=pl.Buffered(1)),
            ],
            # 37 == full last dim of the output array, so this block shape is legal;
            # stores are masked but output traffic is ~10% of the input read.
            out_specs=pl.BlockSpec((tile_m, N_ATOMS), lambda i: (i, 0)),
        ),
        compiler_params=pltpu.CompilerParams(
            dimension_semantics=("parallel",),
        ),
        cost_estimate=cost,
    )(single, weight_t, bias2d)

    return dict(logits=logits)


if __name__ == "__main__":
    key = jax.random.PRNGKey(0)
    k_x, k_w, k_b = jax.random.split(key, 3)

    # Non-multiple-of-tile sequence length: exercises grid_m > 1 and the masked
    # partial last block (no wrapper padding is materialized).
    N_RES = 300

    # Deterministic synthetic inputs / parameters (PyTorch Linear(384, 37) shapes).
    single = jax.random.normal(k_x, (N_RES, C_S), dtype=jnp.float32)
    # PyTorch weight is [37, 384]; pass its transpose to the kernel.
    weight = jax.random.normal(k_w, (N_ATOMS, C_S), dtype=jnp.float32) * 0.02
    bias = jax.random.normal(k_b, (N_ATOMS,), dtype=jnp.float32) * 0.02

    out = experimentally_resolved_head(single, weight.T, bias)
    logits = jax.block_until_ready(out["logits"])

    # Reference check against plain JAX (same semantics as the PyTorch forward).
    ref = jnp.dot(single, weight.T, precision=jax.lax.Precision.HIGHEST) + bias
    assert logits.shape == (N_RES, N_ATOMS)
    assert jnp.allclose(logits, ref, atol=1e-3, rtol=1e-3)

    print("KERNEL_OK")
</pallas_src>

<mosaic_0001>
module attributes {stable_mosaic.version = 11 : i64} {
  func.func @_resolved_head_kernel(%arg0: i32, %arg1: memref<256x384xf32, #tpu.memory_space<vmem>>, %arg2: memref<384x37xf32, #tpu.memory_space<vmem>>, %arg3: memref<1x37xf32, #tpu.memory_space<vmem>>, %arg4: memref<256x37xf32, #tpu.memory_space<vmem>>) attributes {dimension_semantics = [#tpu.dimension_semantics<parallel>], iteration_bounds = array<i64: 2>, scalar_prefetch = 0 : i64, scratch_operands = 0 : i64, tpu.core_type = #tpu.core_type<tc>, window_params = [{transform_indices = @transform_0, window_bounds = array<i64: 256, 384>}, {pipeline_mode = #tpu.pipeline_mode<synchronous>, transform_indices = @transform_1, window_bounds = array<i64: 384, 37>}, {pipeline_mode = #tpu.pipeline_mode<synchronous>, transform_indices = @transform_2, window_bounds = array<i64: 1, 37>}, {transform_indices = @transform_3, window_bounds = array<i64: 256, 37>}]} {
    %c0 = arith.constant 0 : index
    %c0_0 = arith.constant 0 : index
    %0 = vector.load %arg1[%c0, %c0_0] : memref<256x384xf32, #tpu.memory_space<vmem>>, vector<256x384xf32>
    %c0_1 = arith.constant 0 : index
    %c0_2 = arith.constant 0 : index
    %1 = vector.load %arg2[%c0_1, %c0_2] : memref<384x37xf32, #tpu.memory_space<vmem>>, vector<384x37xf32>
    %cst = arith.constant dense<0.000000e+00> : vector<256x37xf32>
    %2 = tpu.matmul %0, %1, %cst {dimension_numbers = #tpu.dot_dimension_numbers<[1], [0], [0], [1], [0, 0, 1, 1], [], []>} : vector<256x384xf32>, vector<384x37xf32>, vector<256x37xf32> -> vector<256x37xf32>
    %c0_3 = arith.constant 0 : index
    %c0_4 = arith.constant 0 : index
    %3 = vector.load %arg3[%c0_3, %c0_4] : memref<1x37xf32, #tpu.memory_space<vmem>>, vector<1x37xf32>
    %4 = vector.broadcast %3 : vector<1x37xf32> to vector<256x37xf32>
    %5 = arith.addf %2, %4 : vector<256x37xf32>
    %c0_5 = arith.constant 0 : index
    %c0_6 = arith.constant 0 : index
    %6 = vector.load %arg4[%c0_5, %c0_6] : memref<256x37xf32, #tpu.memory_space<vmem>>, vector<256x37xf32>
    tpu.vector_store %arg4[%c0_5, %c0_6], %5 {strides = array<i32>} : memref<256x37xf32, #tpu.memory_space<vmem>>, vector<256x37xf32>,
    return
  }
  func.func @transform_0(%arg0: i32) -> (i32, i32) {
    %c0_i32 = arith.constant 0 : i32
    %c0_i32_0 = arith.constant 0 : i32
    return %arg0, %c0_i32 : i32, i32
  }
  func.func @transform_1(%arg0: i32) -> (i32, i32) {
    %c0_i32 = arith.constant 0 : i32
    %c0_i32_0 = arith.constant 0 : i32
    %c0_i32_1 = arith.constant 0 : i32
    return %c0_i32, %c0_i32_0 : i32, i32
  }
  func.func @transform_2(%arg0: i32) -> (i32, i32) {
    %c0_i32 = arith.constant 0 : i32
    %c0_i32_0 = arith.constant 0 : i32
    %c0_i32_1 = arith.constant 0 : i32
    return %c0_i32, %c0_i32_0 : i32, i32
  }
  func.func @transform_3(%arg0: i32) -> (i32, i32) {
    %c0_i32 = arith.constant 0 : i32
    %c0_i32_0 = arith.constant 0 : i32
    return %arg0, %c0_i32 : i32, i32
  }
}

</mosaic_0001>

<bundles_post_ra>
// kernel: experimentally_resolved_head.1
= control target key start
LH: loop header
LB: loop body
LE: loop exit
PB: predicated region body
PF: predicated region fallthrough
CT: control target
= control target key end

     0   :  { %8 = vsyncpa [#allocation3], 0  ;;  %s2358_s0 = inlined_call_operand.hbm [shape: f32[300,384], index: 0, kind: input, shape index: {}]   ;;  %s2359_s1 = inlined_call_operand.vmem [shape: f32[384,37], index: 1, kind: input, shape index: {}]   ;;  %s2360_s2 = inlined_call_operand.vmem [shape: f32[1,37], index: 2, kind: input, shape index: {}]   ;;  %s2361_s3 = inlined_call_operand.vmem [shape: f32[300,37], index: 3, kind: output, shape index: {}]  }
   0x1   :  { %10 = vsyncpa [#allocation3 + $0x1], 0  ;;  %s1716_s12 = smov 0   ;;  %s1718_s13 = smov 0  }
   0x2   :  { %s1720_s14 = smov 0   ;;  %s1722_s15 = smov 0  }
   0x3 LB: > { %s1735_s16 = sadd.s32 4294967295, %s1658_s15   ;;  %s1738_s17 = sadd.s32 1, %s1658_s15   ;;  %s1658_s15 = sphi %s1722_s15, %s2372_s15   ;;  %s1654_s14 = sphi %s1720_s14, %s2371_s14   ;;  %s1650_s13 = sphi %s1718_s13, %s2370_s13   ;;  %s1646_s12 = sphi %s1716_s12, %s2369_s12  }
   0x4   : > { %s20_s18 = ssub.s32 %s1658_s15, %s1738_s17  ;;  %s23_s19 = sadd.s32 1, %s1654_s14 }
   0x5   : > { %p21_p0 = scmp.eq.s32.totalorder %s20_s18, 0  ;;  %p30_p1 = scmp.ne.s32.totalorder %s1654_s14, %s1650_s13 }
   0x6   : > { %p31_p2 = scmp.eq.s32.totalorder %s1658_s15, 0  ;;  %p36_p3 = scmp.ne.s32.totalorder %s1650_s13, %s1646_s12 }
   0x7   : > { %s1748_s20 = scalar_select %p21_p0, %s1654_s14, %s23_s19  }
   0x8   : > { %p32_p4 = por %p31_p2, %p30_p1  ;;  %p37_p5 = scmp.eq.s32.totalorder %s1735_s16, 0 }
   0x9   : > { %p102_p6 = scmp.eq.s32.totalorder %s1735_s16, 1  ;;  %p1190_p9 = scmp.ge.s32.totalorder %s1658_s15, 2 }
   0xa   : > { %p1752_p7 = por %p37_p5, %p36_p3 }
   0xb   : > { %p1756_p8 = por %p102_p6, %p30_p1  ;;  %130 = sbr.rel (%p1190_p9) target bundleno = 54 (0x36), region = 24 }
  0x12   : > { %133 = sbr.rel (!%p32_p4) target bundleno = 54 (0x36), region = 28  ;;  %s134_s23 = sand.u32 (%p32_p4), 1, %s1654_s14  }
  0x13   : > { %s1191_s24 = sshll.u32 (%p32_p4), %s1658_s15, 5  ;;  %s1461_s25 = smul.u32 (%p32_p4), 768, %s134_s23 }
  0x14   : > { %s140_s26 = ssub.s32 (%p32_p4), 38, %s1191_s24  ;;  %s1766_s29 = scalar_lea.sflag (%p32_p4), [#allocation3], %s134_s23 }
  0x15   : > { %p141_p10 = scmp.lt.s32.totalorder (%p32_p4), %s140_s26, 32  ;;  %s138_s30 = scalar_lea.vmem (%p32_p4), [#allocation2], %s1461_s25 }
  0x19   : > { %s2374_s26 = smov (!%p141_p10, %s140_s26), 32 }
  0x1a   : > { %s1763_s27 = smul.u32 384, %s2374_s26 }
  0x1c   : > { %s146_s28 = ssub.s32 12288, %s1763_s27 }
  0x1d   : > { %147 = vsyncadd %s1766_s29, %s146_s28  ;;  %p1194_p11 = scmp.ne.s32.totalorder %s1763_s27, 0  ;;  %s1462_s4 = smul.u32 12288, %s1658_s15 }
  0x1e   : > { %s153_s5 = sshll.u32 %s138_s30, 4  ;;  %s1568_s12 = scalar_lea.hbm %s2358_s0, 14592  ;;  %s1776_s5 = int_to_ptr.vmem [resolvable:$true] %s153_s5 }
  0x1f   : > { %s1774_s8 = scalar_lea.hbm %s2358_s0, %s1462_s4 }
  0x20   : > { %s1564_s9 = scalar_lea.hbm %s1774_s8, %s1763_s27  ;;  %p1569_p1 = scmp.lt.u32.totalorder %s1774_s8, %s2358_s0 }
  0x21   : > { %p1565_p12 = scmp.ne.s32.totalorder %s1774_s8, %s1564_s9  ;;  %p1570_p2 = scmp.lt.u32.totalorder %s1568_s12, %s1564_s9 }
  0x22   : > { %p1572_p4 = scmp.lt.u32.totalorder %s1564_s9, %s1774_s8 }
  0x23   : > { %p1566_p13 = pnand %p1565_p12, %p1194_p11  ;;  %p1571_p3 = por %p1570_p2, %p1569_p1 }
  0x25   : > { %p1567_p0 = pneg %p1566_p13  ;;  %p1573_p5 = por %p1572_p4, %p1571_p3 }
  0x27   : > { %p1574_p6 = pnand %p1573_p5, %p1567_p0 }
  0x29   : > { %1577 = shalt.err (!%p1574_p6)
}
  0x2a   : > { %s1578_s23 = scalar_lea.vmem %s1776_s5, %s1763_s27  ;;  %s1692_s24 = smov [#allocation2]  }
  0x2b   : > { %p1579_p9 = scmp.ne.s32.totalorder %s1776_s5, %s1578_s23  ;;  %s1582_s25 = sshll.u32 %s1692_s24, 4  ;;  %s1583_s25 = int_to_ptr.vmem [resolvable:$false] %s1582_s25 }
  0x2c   : > { %s1584_s26 = scalar_lea.vmem %s1583_s25, 24576  ;;  %p1585_p13 = scmp.lt.s32.totalorder %s1776_s5, %s1583_s25 }
  0x2d   : > { %p1580_p10 = pnand %p1579_p9, %p1194_p11  ;;  %p1586_p1 = scmp.lt.s32.totalorder %s1584_s26, %s1578_s23 }
  0x2f   : > { %p1581_p12 = pneg %p1580_p10  ;;  %p1587_p2 = por %p1586_p1, %p1585_p13 }
  0x31   : > { %p1588_p3 = pnand %p1587_p2, %p1581_p12 }
  0x33   : > { %1591 = shalt.err (!%p1588_p3)
}
  0x34   : > { %s1693_s28 = smov 384   ;;  %s1694_s30 = smov 24  }
  0x35   : > { %159 = dma.hbm_to_vmem [thread:$0]  (%p1194_p11), %s1774_s8, %s1763_s27, %s1776_s5, %s1766_s29, %s1693_s28, %s1693_s28, %s1694_s30  }
  0x36 PF: > { %p1198_p0 = scmp.ge.s32.totalorder %s1658_s15, 1  ;;  %p161_p4 = scmp.lt.s32.totalorder %s1658_s15, 3 }
  0x38   : > { %p162_p5 = pnand %p1198_p0, %p161_p4 }
  0x39   : > { %s1806_s4 = sand.u32 (!%p162_p5), 1, %s1650_s13  }
  0x3a   : > { %165 = sbr.rel (%p162_p5) target bundleno = 497 (0x1f1), region = 32  ;;  %s168_s7 = scalar_lea.sflag (!%p162_p5), [#allocation3], %s1806_s4 }
  0x3b   : > { %s1463_s6 = smul.u32 (!%p162_p5), 768, %s1806_s4 }
  0x3d   : > { %s1810_s9 = scalar_lea.vmem (!%p162_p5), [#allocation2], %s1463_s6 }
  0x41   : > { %1641 = dma.done.wait (%p1752_p7), %s168_s7, 12288  }
  0x42   : > { %1643 = vsyncadd (%p1752_p7), %s168_s7, 4294955008  ;;  %v1695_v0 = vmov 0.0|0.0   ;;  %v300_v1 = vld [vmem:[%s2359_s1] sm:$0xff]  ;;  %v301_v2 = vld [vmem:[%s2359_s1 + $0x8] sm:$0xff]  ;;  %s1199_s29 = sshll.u32 %s1806_s4, 8  ;;  %vm805_vm0 = vcmask 302080  }
  0x43   : > { %1349 = vmatprep.subr.bf16.mxu0 %v1695_v0  ;;  %1429 = vmatprep.subr.bf16.mxu1 %v1695_v0  ;;  %v302_v3 = vld [vmem:[%s2359_s1 + $0x10] sm:$0xff]  ;;  %v1350_v4 = vpack.c.bf16 %v301_v2, %v300_v1  ;;  %v303_v5 = vld [vmem:[%s2359_s1 + $0x18] sm:$0xff]  ;;  %v304_v7 = vld [vmem:[%s2359_s1 + $0x20] sm:$0xff]  ;;  %s2113_s5 = scalar_lea.vmem [#allocation4], %s1199_s29   ;;  %s1202_s4 = sshll.u32 (%p1756_p8), %s1735_s16, 5 }
  0x44   : > { %v1353_v6 = vpack.c.bf16 %v303_v5, %v302_v3  ;;  %v305_v8 = vld [vmem:[%s2359_s1 + $0x28] sm:$0xff]  ;;  %v306_v10 = vld [vmem:[%s2359_s1 + $0x30] sm:$0xff]  ;;  %v307_v11 = vld [vmem:[%s2359_s1 + $0x38] sm:$0xff]  ;;  %s1218_s8 = sshll.u32 (%p1756_p8), %s1735_s16, 8  ;;  %s846_s10 = ssub.s32 (%p1756_p8), 38, %s1202_s4 }
  0x45   : > { %1351 = vmatpush1.bf16.msra.mxu0 %v1350_v4  ;;  %1445 = vmatpush1.bf16.msra.mxu1 %v1350_v4  ;;  %v1356_v9 = vpack.c.bf16 %v305_v8, %v304_v7  ;;  %v205_v12 = vld [vmem:[%s1810_s9 + $0x8] sm:$0xff]  ;;  %v1359_v13 = vpack.c.bf16 %v307_v11, %v306_v10  ;;  %v308_v15 = vld [vmem:[%s2359_s1 + $0x40] sm:$0xff]  ;;  %v310_v18 = vld [vmem:[%s2359_s1 + $0x50] sm:$0xff]  ;;  %s2223_s12 = scalar_lea.vmem (%p1756_p8), %s2361_s3, %s1218_s8   ;;  %p847_p7 = scmp.lt.s32.totalorder (%p1756_p8), %s846_s10, 32 }
  0x46   : > { %1352 = vmatprep.subr.bf16.mxu0 %v1695_v0  ;;  %1430 = vmatprep.subr.bf16.mxu1 %v1695_v0  ;;  %v277_v14 = vld [vmem:[%s1810_s9 + $0x248] sm:$0xff]  ;;  %v311_v19 = vld [vmem:[%s2359_s1 + $0x58] sm:$0xff]  ;;  %v312_v21 = vld [vmem:[%s2359_s1 + $0x60] sm:$0xff] }
  0x47   : > { %v309_v16 = vld [vmem:[%s2359_s1 + $0x48] sm:$0xff]  ;;  %419 = vmatprep.mubr.f32.mxu0 %v205_v12  ;;  %539 = vmatprep.mubr.f32.mxu1 %v277_v14  ;;  %v1365_v20 = vpack.c.bf16 %v311_v19, %v310_v18  ;;  %v314_v24 = vld [vmem:[%s2359_s1 + $0x70] sm:$0xff]  ;;  %v315_v25 = vld [vmem:[%s2359_s1 + $0x78] sm:$0xff] }
  0x48   : > { %v1362_v17 = vpack.c.bf16 %v309_v16, %v308_v15  ;;  %v313_v22 = vld [vmem:[%s2359_s1 + $0x68] sm:$0xff]  ;;  %v1371_v26 = vpack.c.bf16 %v315_v25, %v314_v24  ;;  %v316_v27 = vld [vmem:[%s2359_s1 + $0x80] sm:$0xff]  ;;  %v318_v30 = vld [vmem:[%s2359_s1 + $0x90] sm:$0xff] }
  0x49   : > { %1354 = vmatpush1.bf16.msra.mxu0 %v1353_v6  ;;  %1446 = vmatpush1.bf16.msra.mxu1 %v1353_v6  ;;  %v1368_v23 = vpack.c.bf16 %v313_v22, %v312_v21  ;;  %v317_v28 = vld [vmem:[%s2359_s1 + $0x88] sm:$0xff]  ;;  %v319_v31 = vld [vmem:[%s2359_s1 + $0x98] sm:$0xff]  ;;  %v320_v33 = vld [vmem:[%s2359_s1 + $0xa0] sm:$0xff] }
  0x4a   : > { %1355 = vmatprep.subr.bf16.mxu0 %v1695_v0  ;;  %1431 = vmatprep.subr.bf16.mxu1 %v1695_v0  ;;  %v1374_v29 = vpack.c.bf16 %v317_v28, %v316_v27  ;;  %v1377_v32 = vpack.c.bf16 %v319_v31, %v318_v30  ;;  %v321_v34 = vld [vmem:[%s2359_s1 + $0xa8] sm:$0xff]  ;;  %v322_v36 = vld [vmem:[%s2359_s1 + $0xb0] sm:$0xff]  ;;  %v323_v37 = vld [vmem:[%s2359_s1 + $0xb8] sm:$0xff] }
  0x4b   : > { %v1380_v35 = vpack.c.bf16 %v321_v34, %v320_v33  ;;  %v1383_v38 = vpack.c.bf16 %v323_v37, %v322_v36  ;;  %v324_v39 = vld [vmem:[%s2359_s1 + $0xc0] sm:$0xff]  ;;  %v325_v40 = vld [vmem:[%s2359_s1 + $0xc8] sm:$0xff]  ;;  %v326_v42 = vld [vmem:[%s2359_s1 + $0xd0] sm:$0xff] }
  0x4c   : > { %v1386_v41 = vpack.c.bf16 %v325_v40, %v324_v39  ;;  %v327_v43 = vld [vmem:[%s2359_s1 + $0xd8] sm:$0xff]  ;;  %v328_v45 = vld [vmem:[%s2359_s1 + $0xe0] sm:$0xff]  ;;  %v329_v46 = vld [vmem:[%s2359_s1 + $0xe8] sm:$0xff] }
  0x4d   : > { %1357 = vmatpush1.bf16.msra.mxu0 %v1356_v9  ;;  %1447 = vmatpush1.bf16.msra.mxu1 %v1356_v9  ;;  %v1389_v44 = vpack.c.bf16 %v327_v43, %v326_v42  ;;  %v1392_v47 = vpack.c.bf16 %v329_v46, %v328_v45  ;;  %v330_v48 = vld [vmem:[%s2359_s1 + $0xf0] sm:$0xff]  ;;  %v331_v49 = vld [vmem:[%s2359_s1 + $0xf8] sm:$0xff]  ;;  %v332_v50 = vld [vmem:[%s2359_s1 + $0x100] sm:$0xff] }
  0x4e   : > { %1358 = vmatprep.subr.bf16.mxu0 %v1695_v0  ;;  %1432 = vmatprep.subr.bf16.mxu1 %v1695_v0  ;;  %v333_v51 = vld [vmem:[%s2359_s1 + $0x108] sm:$0xff]  ;;  %v1395_v52 = vpack.c.bf16 %v331_v49, %v330_v48  ;;  %v334_v54 = vld [vmem:[%s2359_s1 + $0x110] sm:$0xff]  ;;  %v335_v55 = vld [vmem:[%s2359_s1 + $0x118] sm:$0xff] }
  0x4f   : > { %v1397_v53 = vpack.c.bf16 %v333_v51, %v332_v50  ;;  %v204_v56 = vld [vmem:[%s1810_s9] sm:$0xff]  ;;  %v1401_v59 = vpack.c.bf16 %v335_v55, %v334_v54  ;;  %v337_v62 = vld [vmem:[%s2359_s1 + $0x128] sm:$0xff]  ;;  %v207_v63 = vld [vmem:[%s1810_s9 + $0x18] sm:$0xff] }
  0x50   : > { %v276_v57 = vld [vmem:[%s1810_s9 + $0x240] sm:$0xff]  ;;  %v211_v1 = vld [vmem:[%s1810_s9 + $0x38] sm:$0xff]  ;;  %v338_v4 = vld [vmem:[%s2359_s1 + $0x130] sm:$0xff] }
  0x51   : > { %1360 = vmatpush1.bf16.msra.mxu0 %v1359_v13  ;;  %1448 = vmatpush1.bf16.msra.mxu1 %v1359_v13  ;;  %v208_v58 = vld [vmem:[%s1810_s9 + $0x20] sm:$0xff]  ;;  %v283_v3 = vld [vmem:[%s1810_s9 + $0x278] sm:$0xff]  ;;  %v210_v6 = vld [vmem:[%s1810_s9 + $0x30] sm:$0xff] }
  0x52   : > { %1361 = vmatprep.subr.bf16.mxu0 %v1695_v0  ;;  %1433 = vmatprep.subr.bf16.mxu1 %v1695_v0  ;;  %v280_v60 = vld [vmem:[%s1810_s9 + $0x260] sm:$0xff]  ;;  %v339_v5 = vld [vmem:[%s2359_s1 + $0x138] sm:$0xff]  ;;  %v282_v7 = vld [vmem:[%s1810_s9 + $0x270] sm:$0xff] }
  0x53   : > { %v336_v61 = vld [vmem:[%s2359_s1 + $0x120] sm:$0xff]  ;;  %v214_v8 = vld [vmem:[%s1810_s9 + $0x50] sm:$0xff]  ;;  %v1409_v9 = vpack.c.bf16 %v339_v5, %v338_v4  ;;  %v341_v12 = vld [vmem:[%s2359_s1 + $0x148] sm:$0xff] }
  0x54   : > { %v1405_v2 = vpack.c.bf16 %v337_v62, %v336_v61  ;;  %v286_v10 = vld [vmem:[%s1810_s9 + $0x290] sm:$0xff]  ;;  %v340_v11 = vld [vmem:[%s2359_s1 + $0x140] sm:$0xff]  ;;  %v213_v13 = vld [vmem:[%s1810_s9 + $0x48] sm:$0xff] }
  0x55   : > { %1363 = vmatpush1.bf16.msra.mxu0 %v1362_v17  ;;  %1449 = vmatpush1.bf16.msra.mxu1 %v1362_v17  ;;  %v285_v14 = vld [vmem:[%s1810_s9 + $0x288] sm:$0xff]  ;;  %v1413_v16 = vpack.c.bf16 %v341_v12, %v340_v11  ;;  %v342_v18 = vld [vmem:[%s2359_s1 + $0x150] sm:$0xff]  ;;  %v343_v19 = vld [vmem:[%s2359_s1 + $0x158] sm:$0xff] }
  0x56   : > { %1364 = vmatprep.subr.bf16.mxu0 %v1695_v0  ;;  %1434 = vmatprep.subr.bf16.mxu1 %v1695_v0  ;;  %v217_v15 = vld [vmem:[%s1810_s9 + $0x68] sm:$0xff]  ;;  %v288_v21 = vld [vmem:[%s1810_s9 + $0x2a0] sm:$0xff]  ;;  %v219_v27 = vld [vmem:[%s1810_s9 + $0x78] sm:$0xff] }
  0x57   : > { %v289_v17 = vld [vmem:[%s1810_s9 + $0x2a8] sm:$0xff]  ;;  %v220_v22 = vld [vmem:[%s1810_s9 + $0x80] sm:$0xff]  ;;  %v291_v28 = vld [vmem:[%s1810_s9 + $0x2b8] sm:$0xff] }
  0x58   : > { %v292_v24 = vld [vmem:[%s1810_s9 + $0x2c0] sm:$0xff]  ;;  %v295_v31 = vld [vmem:[%s1810_s9 + $0x2d8] sm:$0xff]  ;;  %v222_v34 = vld [vmem:[%s1810_s9 + $0x90] sm:$0xff] }
  0x59   : > { %1366 = vmatpush1.bf16.msra.mxu0 %v1365_v20  ;;  %1450 = vmatpush1.bf16.msra.mxu1 %v1365_v20  ;;  %v216_v20 = vld [vmem:[%s1810_s9 + $0x60] sm:$0xff]  ;;  %v347_v33 = vld [vmem:[%s2359_s1 + $0x178] sm:$0xff]  ;;  %v226_v36 = vld [vmem:[%s1810_s9 + $0xb0] sm:$0xff] }
  0x5a   : > { %1367 = vmatprep.subr.bf16.mxu0 %v1695_v0  ;;  %1435 = vmatprep.subr.bf16.mxu1 %v1695_v0  ;;  %v344_v25 = vld [vmem:[%s2359_s1 + $0x160] sm:$0xff]  ;;  %v225_v39 = vld [vmem:[%s1810_s9 + $0xa8] sm:$0xff]  ;;  %v206_v42 = vld [vmem:[%s1810_s9 + $0x10] sm:$0xff] }
  0x5b   : > { %v297_v40 = vld [vmem:[%s1810_s9 + $0x2e8] sm:$0xff]  ;;  %v228_v43 = vld [vmem:[%s1810_s9 + $0xc0] sm:$0xff]  ;;  %v215_v48 = vld [vmem:[%s1810_s9 + $0x58] sm:$0xff] }
  0x5c   : > { %v232_v45 = vld [vmem:[%s1810_s9 + $0xe0] sm:$0xff]  ;;  %v235_v49 = vld [vmem:[%s1810_s9 + $0xf8] sm:$0xff]  ;;  %v218_v50 = vld [vmem:[%s1810_s9 + $0x70] sm:$0xff] }
  0x5d   : > { %1369 = vmatpush1.bf16.msra.mxu0 %v1368_v23  ;;  %1451 = vmatpush1.bf16.msra.mxu1 %v1368_v23  ;;  %v1417_v23 = vpack.c.bf16 %v343_v19, %v342_v18  ;;  %v212_v46 = vld [vmem:[%s1810_s9 + $0x40] sm:$0xff]  ;;  %v234_v51 = vld [vmem:[%s1810_s9 + $0xf0] sm:$0xff]  ;;  %v237_v55 = vld [vmem:[%s1810_s9 + $0x108] sm:$0xff] }
  0x5e   : > { %1370 = vmatprep.subr.bf16.mxu0 %v1695_v0  ;;  %1436 = vmatprep.subr.bf16.mxu1 %v1695_v0  ;;  %v224_v54 = vld [vmem:[%s1810_s9 + $0xa0] sm:$0xff]  ;;  %v245_v4 = vld [vmem:[%s1810_s9 + $0x148] sm:$0xff]  ;;  %v250_v5 = vld [vmem:[%s1810_s9 + $0x170] sm:$0xff] }
  0x5f   : > { %v244_v61 = vld [vmem:[%s1810_s9 + $0x140] sm:$0xff]  ;;  %v257_v12 = vld [vmem:[%s1810_s9 + $0x1a8] sm:$0xff]  ;;  %v266_v18 = vld [vmem:[%s1810_s9 + $0x1f0] sm:$0xff] }
  0x60   : > { %v236_v62 = vld [vmem:[%s1810_s9 + $0x100] sm:$0xff]  ;;  %v258_v19 = vld [vmem:[%s1810_s9 + $0x1b0] sm:$0xff] }
  0x61   : > { %1372 = vmatpush1.bf16.msra.mxu0 %v1371_v26  ;;  %1452 = vmatpush1.bf16.msra.mxu1 %v1371_v26  ;;  %v345_v26 = vld [vmem:[%s2359_s1 + $0x168] sm:$0xff]  ;;  %v252_v11 = vld [vmem:[%s1810_s9 + $0x180] sm:$0xff] }
  0x62   : > { %1373 = vmatprep.subr.bf16.mxu0 %v1695_v0  ;;  %1437 = vmatprep.subr.bf16.mxu1 %v1695_v0  ;;  %v1421_v30 = vpack.c.bf16 %v345_v26, %v344_v25  ;;  %v265_v25 = vld [vmem:[%s1810_s9 + $0x1e8] sm:$0xff]  ;;  %v278_v26 = vld [vmem:[%s1810_s9 + $0x250] sm:$0xff] }
  0x65   : > { %1375 = vmatpush1.bf16.msra.mxu0 %v1374_v29  ;;  %1453 = vmatpush1.bf16.msra.mxu1 %v1374_v29  ;;  %v223_v29 = vld [vmem:[%s1810_s9 + $0x98] sm:$0xff] }
  0x66   : > { %1376 = vmatprep.subr.bf16.mxu0 %v1695_v0  ;;  %1438 = vmatprep.subr.bf16.mxu1 %v1695_v0 }
  0x69   : > { %1378 = vmatpush1.bf16.msra.mxu0 %v1377_v32  ;;  %1454 = vmatpush1.bf16.msra.mxu1 %v1377_v32  ;;  %v346_v32 = vld [vmem:[%s2359_s1 + $0x170] sm:$0xff] }
  0x6a   : > { %1379 = vmatprep.subr.bf16.mxu0 %v1695_v0  ;;  %1439 = vmatprep.subr.bf16.mxu1 %v1695_v0  ;;  %v1425_v37 = vpack.c.bf16 %v347_v33, %v346_v32  ;;  %v287_v32 = vld [vmem:[%s1810_s9 + $0x298] sm:$0xff] }
  0x6b   : > { %v271_v33 = vld [vmem:[%s1810_s9 + $0x218] sm:$0xff] }
  0x6d   : > { %1381 = vmatpush1.bf16.msra.mxu0 %v1380_v35  ;;  %1455 = vmatpush1.bf16.msra.mxu1 %v1380_v35  ;;  %v294_v35 = vld [vmem:[%s1810_s9 + $0x2d0] sm:$0xff] }
  0x6e   : > { %1382 = vmatprep.subr.bf16.mxu0 %v1695_v0  ;;  %1440 = vmatprep.subr.bf16.mxu1 %v1695_v0 }
  0x71   : > { %1384 = vmatpush1.bf16.msra.mxu0 %v1383_v38  ;;  %1456 = vmatpush1.bf16.msra.mxu1 %v1383_v38  ;;  %v298_v38 = vld [vmem:[%s1810_s9 + $0x2f0] sm:$0xff] }
  0x72   : > { %1385 = vmatprep.subr.bf16.mxu0 %v1695_v0  ;;  %1441 = vmatprep.subr.bf16.mxu1 %v1695_v0 }
  0x75   : > { %1387 = vmatpush1.bf16.msra.mxu0 %v1386_v41  ;;  %1457 = vmatpush1.bf16.msra.mxu1 %v1386_v41  ;;  %v229_v41 = vld [vmem:[%s1810_s9 + $0xc8] sm:$0xff] }
  0x76   : > { %1388 = vmatprep.subr.bf16.mxu0 %v1695_v0  ;;  %1442 = vmatprep.subr.bf16.mxu1 %v1695_v0 }
  0x79   : > { %1390 = vmatpush1.bf16.msra.mxu0 %v1389_v44  ;;  %1458 = vmatpush1.bf16.msra.mxu1 %v1389_v44  ;;  %v209_v44 = vld [vmem:[%s1810_s9 + $0x28] sm:$0xff] }
  0x7a   : > { %1391 = vmatprep.subr.bf16.mxu0 %v1695_v0  ;;  %1443 = vmatprep.subr.bf16.mxu1 %v1695_v0 }
  0x7d   : > { %1393 = vmatpush1.bf16.msra.mxu0 %v1392_v47  ;;  %1459 = vmatpush1.bf16.msra.mxu1 %v1392_v47  ;;  %v231_v47 = vld [vmem:[%s1810_s9 + $0xd8] sm:$0xff] }
  0x7e   : > { %1394 = vmatprep.subr.bf16.mxu0 %v1695_v0  ;;  %1444 = vmatprep.subr.bf16.mxu1 %v1695_v0  ;;  %v279_v0 = vld [vmem:[%s1810_s9 + $0x258] sm:$0xff] }
  0x81   : > { %1396 = vmatpush1.bf16.msra.mxu0 %v1395_v52  ;;  %1460 = vmatpush1.bf16.msra.mxu1 %v1395_v52  ;;  %v221_v52 = vld [vmem:[%s1810_s9 + $0x88] sm:$0xff] }
  0x82   : > { %1398 = vmatprep.subr.bf16.mxu1 %v1397_v53 }
  0x84   : > { %420 = vmatmul.mubr.f32.vlgmr.msra.gmra.mrb[0].mxu0 %v204_v56  ;;  %540 = vmatmul.mubr.f32.vlgmr.msra.gmra.mrb[0].mxu1 %v276_v57  ;;  %v227_v56 = vld [vmem:[%s1810_s9 + $0xb8] sm:$0xff]  ;;  %v241_v57 = vld [vmem:[%s1810_s9 + $0x128] sm:$0xff] }
  0x85   : > { %1400 = vmatpush3.bf16.msra.mxu1 %v1397_v53  ;;  %424 = vmatprep.mubr.f32.mxu0 %v208_v58  ;;  %v238_v53 = vld [vmem:[%s1810_s9 + $0x110] sm:$0xff] }
  0x86   : > { %544 = vmatprep.mubr.f32.mxu1 %v280_v60  ;;  %1402 = vmatprep.subr.bf16.mxu1 %v1401_v59  ;;  %v230_v58 = vld [vmem:[%s1810_s9 + $0xd0] sm:$0xff]  ;;  %v233_v60 = vld [vmem:[%s1810_s9 + $0xe8] sm:$0xff] }
  0x88   : > { %425 = vmatmul.mubr.f32.gmra.mrb[2].mxu0 %v207_v63  ;;  %545 = vmatmul.mubr.f32.gmra.mrb[2].mxu1 %v279_v0  ;;  %v243_v63 = vld [vmem:[%s1810_s9 + $0x138] sm:$0xff] }
  0x89   : > { %1404 = vmatpush3.bf16.msra.mxu1 %v1401_v59  ;;  %429 = vmatprep.mubr.f32.mxu0 %v211_v1  ;;  %v240_v59 = vld [vmem:[%s1810_s9 + $0x120] sm:$0xff]  ;;  %v239_v0 = vld [vmem:[%s1810_s9 + $0x118] sm:$0xff] }
  0x8a   : > { %549 = vmatprep.mubr.f32.mxu1 %v283_v3  ;;  %1406 = vmatprep.subr.bf16.mxu1 %v1405_v2  ;;  %v247_v1 = vld [vmem:[%s1810_s9 + $0x158] sm:$0xff]  ;;  %v246_v3 = vld [vmem:[%s1810_s9 + $0x150] sm:$0xff] }
  0x8c   : > { %430 = vmatmul.mubr.f32.gmra.mrb[4].mxu0 %v210_v6  ;;  %550 = vmatmul.mubr.f32.gmra.mrb[4].mxu1 %v282_v7  ;;  %v248_v6 = vld [vmem:[%s1810_s9 + $0x160] sm:$0xff]  ;;  %v249_v7 = vld [vmem:[%s1810_s9 + $0x168] sm:$0xff] }
  0x8d   : > { %1408 = vmatpush3.bf16.msra.mxu1 %v1405_v2  ;;  %434 = vmatprep.mubr.f32.mxu0 %v214_v8  ;;  %v242_v2 = vld [vmem:[%s1810_s9 + $0x130] sm:$0xff]  ;;  %v251_v8 = vld [vmem:[%s1810_s9 + $0x178] sm:$0xff] }
  0x8e   : > { %554 = vmatprep.mubr.f32.mxu1 %v286_v10  ;;  %1410 = vmatprep.subr.bf16.mxu1 %v1409_v9  ;;  %v254_v10 = vld [vmem:[%s1810_s9 + $0x190] sm:$0xff] }
  0x90   : > { %435 = vmatmul.mubr.f32.gmra.mrb[6].mxu0 %v213_v13  ;;  %555 = vmatmul.mubr.f32.gmra.mrb[6].mxu1 %v285_v14  ;;  %v256_v13 = vld [vmem:[%s1810_s9 + $0x1a0] sm:$0xff] }
  0x91   : > { %1412 = vmatpush3.bf16.msra.mxu1 %v1409_v9  ;;  %439 = vmatprep.mubr.f32.mxu0 %v217_v15  ;;  %v253_v9 = vld [vmem:[%s1810_s9 + $0x188] sm:$0xff]  ;;  %v260_v14 = vld [vmem:[%s1810_s9 + $0x1c0] sm:$0xff]  ;;  %v255_v15 = vld [vmem:[%s1810_s9 + $0x198] sm:$0xff] }
  0x92   : > { %559 = vmatprep.mubr.f32.mxu1 %v289_v17  ;;  %1414 = vmatprep.subr.bf16.mxu1 %v1413_v16  ;;  %v259_v17 = vld [vmem:[%s1810_s9 + $0x1b8] sm:$0xff] }
  0x94   : > { %440 = vmatmul.mubr.f32.gmra.mrb[8].mxu0 %v216_v20  ;;  %560 = vmatmul.mubr.f32.gmra.mrb[8].mxu1 %v288_v21  ;;  %v269_v20 = vld [vmem:[%s1810_s9 + $0x208] sm:$0xff]  ;;  %v262_v21 = vld [vmem:[%s1810_s9 + $0x1d0] sm:$0xff] }
  0x95   : > { %1416 = vmatpush3.bf16.msra.mxu1 %v1413_v16  ;;  %444 = vmatprep.mubr.f32.mxu0 %v220_v22  ;;  %v263_v16 = vld [vmem:[%s1810_s9 + $0x1d8] sm:$0xff]  ;;  %v272_v22 = vld [vmem:[%s1810_s9 + $0x220] sm:$0xff] }
  0x96   : > { %564 = vmatprep.mubr.f32.mxu1 %v292_v24  ;;  %1418 = vmatprep.subr.bf16.mxu1 %v1417_v23  ;;  %v275_v24 = vld [vmem:[%s1810_s9 + $0x238] sm:$0xff] }
  0x98   : > { %445 = vmatmul.mubr.f32.gmra.mrb[10].mxu0 %v219_v27  ;;  %565 = vmatmul.mubr.f32.gmra.mrb[10].mxu1 %v291_v28  ;;  %v264_v27 = vld [vmem:[%s1810_s9 + $0x1e0] sm:$0xff]  ;;  %v281_v28 = vld [vmem:[%s1810_s9 + $0x268] sm:$0xff] }
  0x99   : > { %1420 = vmatpush3.bf16.msra.mxu1 %v1417_v23  ;;  %449 = vmatprep.mubr.f32.mxu0 %v223_v29  ;;  %v261_v23 = vld [vmem:[%s1810_s9 + $0x1c8] sm:$0xff]  ;;  %v268_v29 = vld [vmem:[%s1810_s9 + $0x200] sm:$0xff] }
  0x9a   : > { %569 = vmatprep.mubr.f32.mxu1 %v295_v31  ;;  %1422 = vmatprep.subr.bf16.mxu1 %v1421_v30  ;;  %v267_v31 = vld [vmem:[%s1810_s9 + $0x1f8] sm:$0xff] }
  0x9c   : > { %450 = vmatmul.mubr.f32.gmra.mrb[12].mxu0 %v222_v34  ;;  %570 = vmatmul.mubr.f32.gmra.mrb[12].mxu1 %v294_v35  ;;  %v290_v34 = vld [vmem:[%s1810_s9 + $0x2b0] sm:$0xff] }
  0x9d   : > { %1424 = vmatpush3.bf16.msra.mxu1 %v1421_v30  ;;  %454 = vmatprep.mubr.f32.mxu0 %v226_v36  ;;  %v284_v30 = vld [vmem:[%s1810_s9 + $0x280] sm:$0xff]  ;;  %v270_v35 = vld [vmem:[%s1810_s9 + $0x210] sm:$0xff]  ;;  %v293_v36 = vld [vmem:[%s1810_s9 + $0x2c8] sm:$0xff] }
  0x9e   : > { %574 = vmatprep.mubr.f32.mxu1 %v298_v38  ;;  %1426 = vmatprep.subr.bf16.mxu1 %v1425_v37  ;;  %v296_v38 = vld [vmem:[%s1810_s9 + $0x2e0] sm:$0xff] }
  0xa0   : > { %455 = vmatmul.mubr.f32.gmra.mrb[14].mxu0 %v225_v39  ;;  %575 = vmatmul.mubr.f32.gmra.mrb[14].mxu1 %v297_v40  ;;  %v273_v39 = vld [vmem:[%s1810_s9 + $0x228] sm:$0xff]  ;;  %v299_v40 = vld [vmem:[%s1810_s9 + $0x2f8] sm:$0xff] }
  0xa1   : > { %1428 = vmatpush3.bf16.msra.mxu1 %v1425_v37  ;;  %459 = vmatprep.mubr.f32.mxu0 %v229_v41  ;;  %v274_v37 = vld [vmem:[%s1810_s9 + $0x230] sm:$0xff] }
  0xa2   : > { %1301 = vmatprep.mubr.f32.mxu1 %v206_v42 }
  0xa4   : > { %460 = vmatmul.mubr.f32.gmra.mrb[16].mxu0 %v228_v43  ;;  %1302 = vmatmul.mubr.f32.vlgmr.msra.gmra.mrb[16].mxu1 %v209_v44 }
  0xa5   : > { %464 = vmatprep.mubr.f32.mxu0 %v232_v45  ;;  %1304 = vmatprep.mubr.f32.mxu1 %v212_v46 }
  0xa8   : > { %465 = vmatmul.mubr.f32.gmra.mrb[18].mxu0 %v231_v47  ;;  %1305 = vmatmul.mubr.f32.gmra.mrb[18].mxu1 %v215_v48 }
  0xa9   : > { %469 = vmatprep.mubr.f32.mxu0 %v235_v49  ;;  %1307 = vmatprep.mubr.f32.mxu1 %v218_v50 }
  0xac   : > { %470 = vmatmul.mubr.f32.gmra.mrb[20].mxu0 %v234_v51  ;;  %1308 = vmatmul.mubr.f32.gmra.mrb[20].mxu1 %v221_v52 }
  0xad   : > { %474 = vmatprep.mubr.f32.mxu0 %v238_v53  ;;  %1310 = vmatprep.mubr.f32.mxu1 %v224_v54 }
  0xb0   : > { %475 = vmatmul.mubr.f32.gmra.mrb[22].mxu0 %v237_v55  ;;  %1311 = vmatmul.mubr.f32.gmra.mrb[22].mxu1 %v227_v56 }
  0xb1   : > { %479 = vmatprep.mubr.f32.mxu0 %v241_v57  ;;  %1313 = vmatprep.mubr.f32.mxu1 %v230_v58 }
  0xb4   : > { %480 = vmatmul.mubr.f32.gmra.mrb[24].mxu0 %v240_v59  ;;  %1314 = vmatmul.mubr.f32.gmra.mrb[24].mxu1 %v233_v60 }
  0xb5   : > { %484 = vmatprep.mubr.f32.mxu0 %v244_v61  ;;  %1316 = vmatprep.mubr.f32.mxu1 %v236_v62 }
  0xb8   : > { %485 = vmatmul.mubr.f32.gmra.mrb[26].mxu0 %v243_v63  ;;  %1317 = vmatmul.mubr.f32.gmra.mrb[26].mxu1 %v239_v0 }
  0xb9   : > { %489 = vmatprep.mubr.f32.mxu0 %v247_v1  ;;  %1319 = vmatprep.mubr.f32.mxu1 %v242_v2 }
  0xbc   : > { %490 = vmatmul.mubr.f32.gmra.mrb[28].mxu0 %v246_v3  ;;  %1320 = vmatmul.mubr.f32.gmra.mrb[28].mxu1 %v245_v4 }
  0xbd   : > { %494 = vmatprep.mubr.f32.mxu0 %v250_v5  ;;  %1322 = vmatprep.mubr.f32.mxu1 %v248_v6 }
  0xc0   : > { %495 = vmatmul.mubr.f32.gmra.mrb[30].mxu0 %v249_v7  ;;  %1323 = vmatmul.mubr.f32.gmra.mrb[30].mxu1 %v251_v8  ;;  %v2107_v7 = vld [vmem:[%s2360_s2] ss:$0 sm:$0xff] }
  0xc1   : > { %499 = vmatprep.mubr.f32.mxu0 %v253_v9  ;;  %1325 = vmatprep.mubr.f32.mxu1 %v254_v10 }
  0xc4   : > { %500 = vmatmul.mubr.f32.gmra.mrb[32].mxu0 %v252_v11  ;;  %1326 = vmatmul.mubr.f32.gmra.mrb[32].mxu1 %v257_v12 }
  0xc5   : > { %504 = vmatprep.mubr.f32.mxu0 %v256_v13  ;;  %1328 = vmatprep.mubr.f32.mxu1 %v260_v14 }
  0xc8   : > { %505 = vmatmul.mubr.f32.gmra.mrb[34].mxu0 %v255_v15  ;;  %1329 = vmatmul.mubr.f32.gmra.mrb[34].mxu1 %v263_v16 }
  0xc9   : > { %509 = vmatprep.mubr.f32.mxu0 %v259_v17  ;;  %1331 = vmatprep.mubr.f32.mxu1 %v266_v18 }
  0xcc   : > { %510 = vmatmul.mubr.f32.gmra.mrb[36].mxu0 %v258_v19  ;;  %1332 = vmatmul.mubr.f32.gmra.mrb[36].mxu1 %v269_v20 }
  0xcd   : > { %514 = vmatprep.mubr.f32.mxu0 %v262_v21  ;;  %1334 = vmatprep.mubr.f32.mxu1 %v272_v22 }
  0xd0   : > { %515 = vmatmul.mubr.f32.gmra.mrb[38].mxu0 %v261_v23  ;;  %1335 = vmatmul.mubr.f32.gmra.mrb[38].mxu1 %v275_v24 }
  0xd1   : > { %519 = vmatprep.mubr.f32.mxu0 %v265_v25  ;;  %1337 = vmatprep.mubr.f32.mxu1 %v278_v26 }
  0xd4   : > { %520 = vmatmul.mubr.f32.gmra.mrb[40].mxu0 %v264_v27  ;;  %1338 = vmatmul.mubr.f32.gmra.mrb[40].mxu1 %v281_v28 }
  0xd5   : > { %524 = vmatprep.mubr.f32.mxu0 %v268_v29  ;;  %1340 = vmatprep.mubr.f32.mxu1 %v284_v30 }
  0xd8   : > { %525 = vmatmul.mubr.f32.gmra.mrb[42].mxu0 %v267_v31  ;;  %1341 = vmatmul.mubr.f32.gmra.mrb[42].mxu1 %v287_v32 }
  0xd9   : > { %529 = vmatprep.mubr.f32.mxu0 %v271_v33  ;;  %1343 = vmatprep.mubr.f32.mxu1 %v290_v34 }
  0xdc   : > { %530 = vmatmul.mubr.f32.gmra.mrb[44].mxu0 %v270_v35  ;;  %1344 = vmatmul.mubr.f32.gmra.mrb[44].mxu1 %v293_v36 }
  0xdd   : > { %534 = vmatprep.mubr.f32.mxu0 %v274_v37  ;;  %1346 = vmatprep.mubr.f32.mxu1 %v296_v38 }
  0xe0   : > { %535 = vmatmul.mubr.f32.gmra.mrb[46].mxu0 %v273_v39  ;;  %1347 = vmatmul.mubr.f32.gmra.mrb[46].mxu1 %v299_v40 }
 0x157   : > { %v421_v41 = vpop.f32.mrb[0].mxu0  ;;  %v2088_v42 = vpop.f32.mrb[0].mxu1 }
 0x158   : > { %v423_v43 = vpop.f32.mrb[1].mxu0  ;;  %v543_v44 = vpop.f32.mrb[1].mxu1  ;;  %v422_v11 = vadd.f32 %v2107_v7, %v421_v41 }
 0x15b   : > { %v426_v45 = vpop.f32.mrb[2].mxu0  ;;  %v2090_v46 = vpop.f32.mrb[2].mxu1 }
 0x15c   : > { %v428_v47 = vpop.f32.mrb[3].mxu0  ;;  %v548_v48 = vpop.f32.mrb[3].mxu1  ;;  %v427_v10 = vadd.f32 %v2107_v7, %v426_v45 }
 0x15f   : > { %v431_v49 = vpop.f32.mrb[4].mxu0  ;;  %v2092_v50 = vpop.f32.mrb[4].mxu1 }
 0x160   : > { %v433_v51 = vpop.f32.mrb[5].mxu0  ;;  %v553_v52 = vpop.f32.mrb[5].mxu1  ;;  %v432_v19 = vadd.f32 %v2107_v7, %v431_v49 }
 0x163   : > { %v436_v53 = vpop.f32.mrb[6].mxu0  ;;  %v2094_v54 = vpop.f32.mrb[6].mxu1 }
 0x164   : > { %v438_v55 = vpop.f32.mrb[7].mxu0  ;;  %v558_v56 = vpop.f32.mrb[7].mxu1  ;;  %v437_v18 = vadd.f32 %v2107_v7, %v436_v53 }
 0x167   : > { %v441_v57 = vpop.f32.mrb[8].mxu0  ;;  %v2096_v58 = vpop.f32.mrb[8].mxu1 }
 0x168   : > { %v443_v59 = vpop.f32.mrb[9].mxu0  ;;  %v563_v60 = vpop.f32.mrb[9].mxu1  ;;  %v442_v27 = vadd.f32 %v2107_v7, %v441_v57 }
 0x16b   : > { %v446_v61 = vpop.f32.mrb[10].mxu0  ;;  %v2098_v62 = vpop.f32.mrb[10].mxu1 }
 0x16c   : > { %v448_v63 = vpop.f32.mrb[11].mxu0  ;;  %v568_v0 = vpop.f32.mrb[11].mxu1  ;;  %v447_v26 = vadd.f32 %v2107_v7, %v446_v61 }
 0x16f   : > { %v451_v1 = vpop.f32.mrb[12].mxu0  ;;  %v2100_v2 = vpop.f32.mrb[12].mxu1 }
 0x170   : > { %v453_v3 = vpop.f32.mrb[13].mxu0  ;;  %v573_v4 = vpop.f32.mrb[13].mxu1  ;;  %v452_v35 = vadd.f32 %v2107_v7, %v451_v1 }
 0x173   : > { %v456_v5 = vpop.f32.mrb[14].mxu0  ;;  %v2102_v6 = vpop.f32.mrb[14].mxu1 }
 0x174   : > { %v458_v8 = vpop.f32.mrb[15].mxu0  ;;  %v578_v9 = vpop.f32.mrb[15].mxu1  ;;  %v457_v34 = vadd.f32 %v2107_v7, %v456_v5 }
 0x177   : > { %v461_v12 = vpop.f32.mrb[16].mxu0  ;;  %v1303_v13 = vpop.f32.mrb[16].mxu1 }
 0x178   : > { %v652_v14 = vadd.f32 %v1303_v13, %v427_v10  ;;  %v463_v15 = vpop.f32.mrb[17].mxu0  ;;  %v646_v16 = vpop.f32.mrb[17].mxu1  ;;  %v462_v44 = vadd.f32 %v2107_v7, %v461_v12 }
 0x179   : > { %v647_v17 = vadd.f32 %v646_v16, %v422_v11 }
 0x17a   : > { %807 = vst.msk [vmem:[%s2113_s5 + $0x8] sm:$0xff] %vm805_vm0, %v652_v14 }
 0x17b   : > { %806 = vst.msk [vmem:[%s2113_s5] sm:$0xff] %vm805_vm0, %v647_v17  ;;  %v466_v20 = vpop.f32.mrb[18].mxu0  ;;  %v1306_v21 = vpop.f32.mrb[18].mxu1 }
 0x17c   : > { %v662_v22 = vadd.f32 %v1306_v21, %v437_v18  ;;  %v468_v23 = vpop.f32.mrb[19].mxu0  ;;  %v656_v24 = vpop.f32.mrb[19].mxu1  ;;  %v467_v43 = vadd.f32 %v2107_v7, %v466_v20 }
 0x17d   : > { %v657_v25 = vadd.f32 %v656_v24, %v432_v19 }
 0x17e   : > { %809 = vst.msk [vmem:[%s2113_s5 + $0x18] sm:$0xff] %vm805_vm0, %v662_v22 }
 0x17f   : > { %808 = vst.msk [vmem:[%s2113_s5 + $0x10] sm:$0xff] %vm805_vm0, %v657_v25  ;;  %v471_v28 = vpop.f32.mrb[20].mxu0  ;;  %v1309_v29 = vpop.f32.mrb[20].mxu1 }
 0x180   : > { %v672_v30 = vadd.f32 %v1309_v29, %v447_v26  ;;  %v473_v31 = vpop.f32.mrb[21].mxu0  ;;  %v666_v32 = vpop.f32.mrb[21].mxu1  ;;  %v472_v55 = vadd.f32 %v2107_v7, %v471_v28 }
 0x181   : > { %v667_v33 = vadd.f32 %v666_v32, %v442_v27 }
 0x182   : > { %811 = vst.msk [vmem:[%s2113_s5 + $0x28] sm:$0xff] %vm805_vm0, %v672_v30 }
 0x183   : > { %810 = vst.msk [vmem:[%s2113_s5 + $0x20] sm:$0xff] %vm805_vm0, %v667_v33  ;;  %v476_v36 = vpop.f32.mrb[22].mxu0  ;;  %v1312_v37 = vpop.f32.mrb[22].mxu1 }
 0x184   : > { %v682_v38 = vadd.f32 %v1312_v37, %v457_v34  ;;  %v478_v39 = vpop.f32.mrb[23].mxu0  ;;  %v676_v40 = vpop.f32.mrb[23].mxu1  ;;  %v477_v53 = vadd.f32 %v2107_v7, %v476_v36 }
 0x185   : > { %v677_v41 = vadd.f32 %v676_v40, %v452_v35 }
 0x186   : > { %813 = vst.msk [vmem:[%s2113_s5 + $0x38] sm:$0xff] %vm805_vm0, %v682_v38 }
 0x187   : > { %812 = vst.msk [vmem:[%s2113_s5 + $0x30] sm:$0xff] %vm805_vm0, %v677_v41  ;;  %v481_v45 = vpop.f32.mrb[24].mxu0  ;;  %v1315_v47 = vpop.f32.mrb[24].mxu1 }
 0x188   : > { %v692_v48 = vadd.f32 %v1315_v47, %v467_v43  ;;  %v483_v49 = vpop.f32.mrb[25].mxu0  ;;  %v686_v51 = vpop.f32.mrb[25].mxu1  ;;  %v482_v1 = vadd.f32 %v2107_v7, %v481_v45  ;;  %v547_v43 = vadd.f32 %v2107_v7, %v2090_v46  ;;  %v542_v45 = vadd.f32 %v2107_v7, %v2088_v42 }
 0x189   : > { %v687_v52 = vadd.f32 %v686_v51, %v462_v44  ;;  %v552_v42 = vadd.f32 %v2107_v7, %v2092_v50  ;;  %v562_v50 = vadd.f32 %v2107_v7, %v2096_v58 }
 0x18a   : > { %815 = vst.msk [vmem:[%s2113_s5 + $0x48] sm:$0xff] %vm805_vm0, %v692_v48 }
 0x18b   : > { %814 = vst.msk [vmem:[%s2113_s5 + $0x40] sm:$0xff] %vm805_vm0, %v687_v52  ;;  %v486_v56 = vpop.f32.mrb[26].mxu0  ;;  %v1318_v57 = vpop.f32.mrb[26].mxu1 }
 0x18c   : > { %v702_v59 = vadd.f32 %v1318_v57, %v477_v53  ;;  %v488_v60 = vpop.f32.mrb[27].mxu0  ;;  %v696_v61 = vpop.f32.mrb[27].mxu1  ;;  %v487_v0 = vadd.f32 %v2107_v7, %v486_v56  ;;  %v557_v56 = vadd.f32 %v2107_v7, %v2094_v54 }
 0x18d   : > { %v697_v63 = vadd.f32 %v696_v61, %v472_v55 }
 0x18e   : > { %817 = vst.msk [vmem:[%s2113_s5 + $0x58] sm:$0xff] %vm805_vm0, %v702_v59 }
 0x18f   : > { %816 = vst.msk [vmem:[%s2113_s5 + $0x50] sm:$0xff] %vm805_vm0, %v697_v63  ;;  %v491_v3 = vpop.f32.mrb[28].mxu0  ;;  %v1321_v4 = vpop.f32.mrb[28].mxu1 }
 0x190   : > { %v712_v5 = vadd.f32 %v1321_v4, %v487_v0  ;;  %v493_v8 = vpop.f32.mrb[29].mxu0  ;;  %v706_v9 = vpop.f32.mrb[29].mxu1  ;;  %v492_v11 = vadd.f32 %v2107_v7, %v491_v3 }
 0x191   : > { %v707_v10 = vadd.f32 %v706_v9, %v482_v1  ;;  %v567_v1 = vadd.f32 %v2107_v7, %v2098_v62 }
 0x192   : > { %819 = vst.msk [vmem:[%s2113_s5 + $0x68] sm:$0xff] %vm805_vm0, %v712_v5 }
 0x193   : > { %818 = vst.msk [vmem:[%s2113_s5 + $0x60] sm:$0xff] %vm805_vm0, %v707_v10  ;;  %v496_v12 = vpop.f32.mrb[30].mxu0  ;;  %v1324_v13 = vpop.f32.mrb[30].mxu1 }
 0x194   : > { %v497_v14 = vadd.f32 %v2107_v7, %v496_v12  ;;  %v498_v15 = vpop.f32.mrb[31].mxu0  ;;  %v716_v16 = vpop.f32.mrb[31].mxu1  ;;  %v577_v12 = vadd.f32 %v2107_v7, %v2102_v6 }
 0x195   : > { %v717_v17 = vadd.f32 %v716_v16, %v492_v11 }
 0x196   : > { %v722_v18 = vadd.f32 %v1324_v13, %v497_v14  ;;  %v572_v13 = vadd.f32 %v2107_v7, %v2100_v2 }
 0x197   : > { %820 = vst.msk [vmem:[%s2113_s5 + $0x70] sm:$0xff] %vm805_vm0, %v717_v17  ;;  %v501_v19 = vpop.f32.mrb[32].mxu0  ;;  %v1327_v20 = vpop.f32.mrb[32].mxu1 }
 0x198   : > { %821 = vst.msk [vmem:[%s2113_s5 + $0x78] sm:$0xff] %vm805_vm0, %v722_v18  ;;  %v502_v21 = vadd.f32 %v2107_v7, %v501_v19  ;;  %v503_v22 = vpop.f32.mrb[33].mxu0  ;;  %v726_v23 = vpop.f32.mrb[33].mxu1 }
 0x19a   : > { %v727_v24 = vadd.f32 %v726_v23, %v502_v21 }
 0x19b   : > { %v506_v25 = vpop.f32.mrb[34].mxu0  ;;  %v1330_v26 = vpop.f32.mrb[34].mxu1 }
 0x19c   : > { %822 = vst.msk [vmem:[%s2113_s5 + $0x80] sm:$0xff] %vm805_vm0, %v727_v24  ;;  %v507_v27 = vadd.f32 %v2107_v7, %v506_v25  ;;  %v508_v28 = vpop.f32.mrb[35].mxu0  ;;  %v736_v29 = vpop.f32.mrb[35].mxu1 }
 0x19e   : > { %v732_v30 = vadd.f32 %v1327_v20, %v507_v27 }
 0x19f   : > { %v511_v31 = vpop.f32.mrb[36].mxu0  ;;  %v1333_v32 = vpop.f32.mrb[36].mxu1 }
 0x1a0   : > { %823 = vst.msk [vmem:[%s2113_s5 + $0x88] sm:$0xff] %vm805_vm0, %v732_v30  ;;  %v512_v33 = vadd.f32 %v2107_v7, %v511_v31  ;;  %v513_v34 = vpop.f32.mrb[37].mxu0  ;;  %v746_v35 = vpop.f32.mrb[37].mxu1 }
 0x1a2   : > { %v737_v36 = vadd.f32 %v736_v29, %v512_v33 }
 0x1a3   : > { %v516_v37 = vpop.f32.mrb[38].mxu0  ;;  %v1336_v38 = vpop.f32.mrb[38].mxu1 }
 0x1a4   : > { %824 = vst.msk [vmem:[%s2113_s5 + $0x90] sm:$0xff] %vm805_vm0, %v737_v36  ;;  %v517_v39 = vadd.f32 %v2107_v7, %v516_v37  ;;  %v518_v40 = vpop.f32.mrb[39].mxu0  ;;  %v756_v41 = vpop.f32.mrb[39].mxu1 }
 0x1a6   : > { %v742_v44 = vadd.f32 %v1330_v26, %v517_v39 }
 0x1a7   : > { %v521_v47 = vpop.f32.mrb[40].mxu0  ;;  %v1339_v48 = vpop.f32.mrb[40].mxu1 }
 0x1a8   : > { %825 = vst.msk [vmem:[%s2113_s5 + $0x98] sm:$0xff] %vm805_vm0, %v742_v44  ;;  %v522_v49 = vadd.f32 %v2107_v7, %v521_v47  ;;  %v772_v51 = vadd.f32 %v1339_v48, %v547_v43  ;;  %v523_v52 = vpop.f32.mrb[41].mxu0  ;;  %v766_v53 = vpop.f32.mrb[41].mxu1 }
 0x1a9   : > { %v767_v55 = vadd.f32 %v766_v53, %v542_v45 }
 0x1aa   : > { %v747_v46 = vadd.f32 %v746_v35, %v522_v49  ;;  %831 = vst.msk [vmem:[%s2113_s5 + $0xc8] sm:$0xff] %vm805_vm0, %v772_v51 }
 0x1ab   : > { %830 = vst.msk [vmem:[%s2113_s5 + $0xc0] sm:$0xff] %vm805_vm0, %v767_v55  ;;  %v526_v57 = vpop.f32.mrb[42].mxu0  ;;  %v1342_v59 = vpop.f32.mrb[42].mxu1 }
 0x1ac   : > { %826 = vst.msk [vmem:[%s2113_s5 + $0xa0] sm:$0xff] %vm805_vm0, %v747_v46  ;;  %v527_v60 = vadd.f32 %v2107_v7, %v526_v57  ;;  %v782_v61 = vadd.f32 %v1342_v59, %v557_v56  ;;  %v528_v63 = vpop.f32.mrb[43].mxu0  ;;  %v776_v0 = vpop.f32.mrb[43].mxu1 }
 0x1ad   : > { %v777_v54 = vadd.f32 %v776_v0, %v552_v42 }
 0x1ae   : > { %v752_v3 = vadd.f32 %v1333_v32, %v527_v60  ;;  %833 = vst.msk [vmem:[%s2113_s5 + $0xd8] sm:$0xff] %vm805_vm0, %v782_v61 }
 0x1af   : > { %832 = vst.msk [vmem:[%s2113_s5 + $0xd0] sm:$0xff] %vm805_vm0, %v777_v54  ;;  %v531_v4 = vpop.f32.mrb[44].mxu0  ;;  %v1345_v5 = vpop.f32.mrb[44].mxu1 }
 0x1b0   : > { %827 = vst.msk [vmem:[%s2113_s5 + $0xa8] sm:$0xff] %vm805_vm0, %v752_v3  ;;  %v532_v8 = vadd.f32 %v2107_v7, %v531_v4  ;;  %v792_v9 = vadd.f32 %v1345_v5, %v567_v1  ;;  %v533_v10 = vpop.f32.mrb[45].mxu0  ;;  %v786_v11 = vpop.f32.mrb[45].mxu1 }
 0x1b1   : > { %v787_v62 = vadd.f32 %v786_v11, %v562_v50 }
 0x1b2   : > { %v757_v58 = vadd.f32 %v756_v41, %v532_v8  ;;  %835 = vst.msk [vmem:[%s2113_s5 + $0xe8] sm:$0xff] %vm805_vm0, %v792_v9  ;;  %844 = sbr.rel (!%p1756_p8) target bundleno = 497 (0x1f1), region = 40 }
 0x1b3   : > { %834 = vst.msk [vmem:[%s2113_s5 + $0xe0] sm:$0xff] %vm805_vm0, %v787_v62  ;;  %v536_v14 = vpop.f32.mrb[46].mxu0  ;;  %v1348_v15 = vpop.f32.mrb[46].mxu1 }
 0x1b4   : > { %828 = vst.msk [vmem:[%s2113_s5 + $0xb0] sm:$0xff] %vm805_vm0, %v757_v58  ;;  %v537_v16 = vadd.f32 %v2107_v7, %v536_v14  ;;  %v802_v17 = vadd.f32 %v1348_v15, %v577_v12  ;;  %v538_v18 = vpop.f32.mrb[47].mxu0  ;;  %v796_v19 = vpop.f32.mrb[47].mxu1 }
 0x1b5   : > { %v797_v20 = vadd.f32 %v796_v19, %v572_v13 }
 0x1b6   : > { %v762_v6 = vadd.f32 %v1336_v38, %v537_v16  ;;  %837 = vst.msk [vmem:[%s2113_s5 + $0xf8] sm:$0xff] %vm805_vm0, %v802_v17 }
 0x1b7   : > { %836 = vst.msk [vmem:[%s2113_s5 + $0xf0] sm:$0xff] %vm805_vm0, %v797_v20 }
 0x1b8   : > { %829 = vst.msk [vmem:[%s2113_s5 + $0xb8] sm:$0xff] %vm805_vm0, %v762_v6 }
 0x1b9   : > { %s2376_s10 = smov (!%p847_p7, %s846_s10), 32 }
 0x1ba   : > { %s1203_s18 = sshll.u32 %s2376_s10, 7 }
 0x1bb   : > { %p1206_p11 = scmp.eq.s32.totalorder %s1203_s18, 0 }
 0x1bc   : > { %s2229_s22 = sshrl.u32 (!%p1206_p11), %s2376_s10, 5 }
 0x1bd   : > { %855 = sbr.rel (%p1206_p11) target bundleno = 497 (0x1f1), region = 44  ;;  %p1207_p8 = scmp.le.s32.totalorder (!%p1206_p11), %s2229_s22, 0 }
 0x1c4   : > { %1141 = sbr.rel (%p1207_p8) target bundleno = 476 (0x1dc), region = 126  ;;  %s2364_s16 = smov (!%p1207_p8), %s2223_s12 }
 0x1c5   : > { %s2365_s19 = smov (!%p1207_p8), %s2113_s5  ;;  %s2238_s23 = smov (!%p1207_p8), 0  }
 0x1c6   : > { %s2240_s24 = smov (!%p1207_p8), 0  }
 0x1cb LB: >> { %v979_v2 = vld [vmem:[%s1666_s19] sm:$0xff]  ;;  %v981_v7 = vld [vmem:[%s1666_s19 + $0x8] sm:$0xff]  ;;  %v983_v21 = vld [vmem:[%s1666_s19 + $0x10] sm:$0xff]  ;;  %s1043_s25 = sadd.s32 1, %s1670_s23  ;;  %s973_s24 = sadd.s32 1, %s1674_s24   ;;  %s1674_s24 = sphi %s2240_s24, %s973_s24   ;;  %s1670_s23 = sphi %s2238_s23, %s2368_s23   ;;  %s1666_s19 = sphi %s2365_s19, %s2367_s19   ;;  %s1662_s16 = sphi %s2364_s16, %s2366_s16  }
 0x1cc   : >> { %980 = vst [vmem:[%s1662_s16] sm:$0xff] %v979_v2  ;;  %982 = vst [vmem:[%s1662_s16 + $0x8] sm:$0xff] %v981_v7  ;;  %v985_v22 = vld [vmem:[%s1666_s19 + $0x18] sm:$0xff]  ;;  %v987_v23 = vld [vmem:[%s1666_s19 + $0x20] sm:$0xff]  ;;  %p1044_p6 = scmp.ge.s32.totalorder %s1043_s25, %s2229_s22  ;;  %p972_p9 = scmp.ge.s32.totalorder %s973_s24, %s2229_s22 }
 0x1cd   : >> { %984 = vst [vmem:[%s1662_s16 + $0x10] sm:$0xff] %v983_v21  ;;  %v989_v24 = vld [vmem:[%s1666_s19 + $0x28] sm:$0xff]  ;;  %986 = vst [vmem:[%s1662_s16 + $0x18] sm:$0xff] %v985_v22  ;;  %v991_v25 = vld [vmem:[%s1666_s19 + $0x30] sm:$0xff] }
 0x1ce   : >> { %988 = vst [vmem:[%s1662_s16 + $0x20] sm:$0xff] %v987_v23  ;;  %990 = vst [vmem:[%s1662_s16 + $0x28] sm:$0xff] %v989_v24  ;;  %v993_v26 = vld [vmem:[%s1666_s19 + $0x38] sm:$0xff]  ;;  %v995_v27 = vld [vmem:[%s1666_s19 + $0x40] sm:$0xff]  ;;  %s2378_s25 = smov (%p1044_p6, %s1043_s25), 0 }
 0x1cf   : >> { %992 = vst [vmem:[%s1662_s16 + $0x30] sm:$0xff] %v991_v25  ;;  %994 = vst [vmem:[%s1662_s16 + $0x38] sm:$0xff] %v993_v26  ;;  %v997_v28 = vld [vmem:[%s1666_s19 + $0x48] sm:$0xff]  ;;  %v999_v29 = vld [vmem:[%s1666_s19 + $0x50] sm:$0xff]  ;;  %s1208_s26 = sshll.u32 %s2378_s25, 8  ;;  %s2368_s23 = smov %s2378_s25 }
 0x1d0   : >> { %996 = vst [vmem:[%s1662_s16 + $0x40] sm:$0xff] %v995_v27  ;;  %v1001_v30 = vld [vmem:[%s1666_s19 + $0x58] sm:$0xff]  ;;  %998 = vst [vmem:[%s1662_s16 + $0x48] sm:$0xff] %v997_v28  ;;  %v1003_v31 = vld [vmem:[%s1666_s19 + $0x60] sm:$0xff]  ;;  %s2296_s28 = scalar_lea.vmem %s2113_s5, %s1208_s26 [#allocation4]   ;;  %s1049_s30 = scalar_lea.vmem %s2223_s12, %s1208_s26  }
 0x1d1   : >> { %1000 = vst [vmem:[%s1662_s16 + $0x50] sm:$0xff] %v999_v29  ;;  %1002 = vst [vmem:[%s1662_s16 + $0x58] sm:$0xff] %v1001_v30  ;;  %v1005_v32 = vld [vmem:[%s1666_s19 + $0x68] sm:$0xff]  ;;  %v1007_v33 = vld [vmem:[%s1666_s19 + $0x70] sm:$0xff] }
 0x1d2   : >> { %1004 = vst [vmem:[%s1662_s16 + $0x60] sm:$0xff] %v1003_v31  ;;  %1006 = vst [vmem:[%s1662_s16 + $0x68] sm:$0xff] %v1005_v32  ;;  %v1009_v34 = vld [vmem:[%s1666_s19 + $0x78] sm:$0xff]  ;;  %v1011_v35 = vld [vmem:[%s1666_s19 + $0x80] sm:$0xff] }
 0x1d3   : >> { %1008 = vst [vmem:[%s1662_s16 + $0x70] sm:$0xff] %v1007_v33  ;;  %v1013_v36 = vld [vmem:[%s1666_s19 + $0x88] sm:$0xff]  ;;  %1010 = vst [vmem:[%s1662_s16 + $0x78] sm:$0xff] %v1009_v34  ;;  %v1015_v37 = vld [vmem:[%s1666_s19 + $0x90] sm:$0xff] }
 0x1d4   : >> { %1012 = vst [vmem:[%s1662_s16 + $0x80] sm:$0xff] %v1011_v35  ;;  %1014 = vst [vmem:[%s1662_s16 + $0x88] sm:$0xff] %v1013_v36  ;;  %v1017_v38 = vld [vmem:[%s1666_s19 + $0x98] sm:$0xff]  ;;  %v1019_v39 = vld [vmem:[%s1666_s19 + $0xa0] sm:$0xff] }
 0x1d5   : >> { %1016 = vst [vmem:[%s1662_s16 + $0x90] sm:$0xff] %v1015_v37  ;;  %1018 = vst [vmem:[%s1662_s16 + $0x98] sm:$0xff] %v1017_v38  ;;  %v1021_v40 = vld [vmem:[%s1666_s19 + $0xa8] sm:$0xff]  ;;  %v1023_v41 = vld [vmem:[%s1666_s19 + $0xb0] sm:$0xff]  ;;  %975 = sbr.rel (!%p972_p9) target bundleno = 459 (0x1cb), region = 132 }
 0x1d6   : >> { %1020 = vst [vmem:[%s1662_s16 + $0xa0] sm:$0xff] %v1019_v39  ;;  %v1025_v43 = vld [vmem:[%s1666_s19 + $0xb8] sm:$0xff]  ;;  %1022 = vst [vmem:[%s1662_s16 + $0xa8] sm:$0xff] %v1021_v40  ;;  %v1027_v44 = vld [vmem:[%s1666_s19 + $0xc0] sm:$0xff] }
 0x1d7   : >> { %1024 = vst [vmem:[%s1662_s16 + $0xb0] sm:$0xff] %v1023_v41  ;;  %1026 = vst [vmem:[%s1662_s16 + $0xb8] sm:$0xff] %v1025_v43  ;;  %v1029_v45 = vld [vmem:[%s1666_s19 + $0xc8] sm:$0xff]  ;;  %v1031_v47 = vld [vmem:[%s1666_s19 + $0xd0] sm:$0xff] }
 0x1d8   : >> { %1028 = vst [vmem:[%s1662_s16 + $0xc0] sm:$0xff] %v1027_v44  ;;  %1030 = vst [vmem:[%s1662_s16 + $0xc8] sm:$0xff] %v1029_v45  ;;  %v1033_v48 = vld [vmem:[%s1666_s19 + $0xd8] sm:$0xff]  ;;  %v1035_v49 = vld [vmem:[%s1666_s19 + $0xe0] sm:$0xff] }
 0x1d9   : >> { %1032 = vst [vmem:[%s1662_s16 + $0xd0] sm:$0xff] %v1031_v47  ;;  %v1037_v51 = vld [vmem:[%s1666_s19 + $0xe8] sm:$0xff]  ;;  %1034 = vst [vmem:[%s1662_s16 + $0xd8] sm:$0xff] %v1033_v48  ;;  %v1039_v52 = vld [vmem:[%s1666_s19 + $0xf0] sm:$0xff] }
 0x1da   : >> { %1036 = vst [vmem:[%s1662_s16 + $0xe0] sm:$0xff] %v1035_v49  ;;  %1038 = vst [vmem:[%s1662_s16 + $0xe8] sm:$0xff] %v1037_v51  ;;  %v1041_v53 = vld [vmem:[%s1666_s19 + $0xf8] sm:$0xff]  ;;  %s2367_s19 = smov %s2296_s28 }
 0x1db   : >> { %1040 = vst [vmem:[%s1662_s16 + $0xf0] sm:$0xff] %v1039_v52  ;;  %1042 = vst [vmem:[%s1662_s16 + $0xf8] sm:$0xff] %v1041_v53  ;;  %s2366_s16 = smov %s1049_s30 }
 0x1dc PF: > { %s2337_s6 = sand.u32 31, %s2376_s10   ;;  %s1219_s7 = sshll.u32 %s2229_s22, 8 }
 0x1dd   : > { %s1054_s15 = scalar_lea.vmem %s2113_s5, %s1219_s7 [#allocation4]   ;;  %s1056_s9 = scalar_lea.vmem %s2223_s12, %s1219_s7  }
 0x1de   : > { %p1213_p10 = scmp.le.s32.totalorder %s2337_s6, 0 }
 0x1df   : > { %s1676_s27 = smov (!%p1213_p10), %s1056_s9   ;;  %s1680_s29 = smov (!%p1213_p10), %s1054_s15  }
 0x1e0   : > { %1155 = sbr.rel (%p1213_p10) target bundleno = 497 (0x1f1), region = 137  ;;  %s1684_s4 = smov (!%p1213_p10), 0  }
 0x1e1   : > { %s1688_s8 = smov (!%p1213_p10), 0  }
 0x1e7 LB: >> { %v1066_v55 = vld [vmem:[%s1682_s29] sm:$0xff]  ;;  %s1068_s10 = sadd.s32 1, %s1686_s4  ;;  %s1060_s8 = sadd.s32 1, %s1690_s8   ;;  %s1690_s8 = sphi %s1688_s8, %s1060_s8   ;;  %s1686_s4 = sphi %s1684_s4, %s1685_s4   ;;  %s1682_s29 = sphi %s1680_s29, %s1073_s29   ;;  %s1678_s27 = sphi %s1676_s27, %s1074_s27  }
 0x1e8   : >> { %1067 = vst [vmem:[%s1678_s27] sm:$0xff] %v1066_v55  ;;  %p1069_p12 = scmp.ge.s32.totalorder %s1068_s10, %s2337_s6  ;;  %p1059_p13 = scmp.ge.s32.totalorder %s1060_s8, %s2337_s6 }
 0x1ea   : >> { %s2380_s10 = smov (%p1069_p12, %s1068_s10), 0  ;;  %1062 = sbr.rel (!%p1059_p13) target bundleno = 487 (0x1e7), region = 143 }
 0x1eb   : >> { %s1214_s5 = sshll.u32 %s2380_s10, 3  ;;  %s1685_s4 = smov %s2380_s10  }
 0x1ec   : >> { %s1073_s29 = scalar_lea.vmem %s1054_s15, %s1214_s5 [#allocation4]   ;;  %s1074_s27 = scalar_lea.vmem %s1056_s9, %s1214_s5  }
 0x1f1 PF: > { %p13_p1 = scmp.ge.s32.totalorder %s1738_s17, 4   ;;  %s2369_s12 = smov %s1650_s13 }
 0x1f2   : > { %s2370_s13 = smov %s1654_s14  ;;  %s2371_s14 = smov %s1748_s20 }
 0x1f3   : > { %s2372_s15 = smov %s1738_s17  ;;  %15 = sbr.rel (!%p13_p1) target bundleno = 3 (0x3), region = 154 }
 0x1fa   :  { %1090 = vsyncpa [#allocation3], 1 }
 0x1fb   :  { %1092 = vsyncpa [#allocation3 + $0x1], 1 }

</bundles_post_ra>
